<compile_context>
chip_gen: v5e
topology: v5e:2x2
jax: 0.10.0
libtpu: 0.0.40
codegen_flags: <defaults>
</compile_context>

<pallas_src>
import functools

import jax
import jax.numpy as jnp
from jax.experimental import pallas as pl
from jax.experimental.pallas import tpu as pltpu

HIDDEN = 16      # LSTM hidden size (fixed by the module)
FC1 = 128        # fc1 width (fixed by the module)


def _drqn_kernel(x_ref, h0_ref, c0_ref,
                 wih_ref, whh_ref, b_ref,
                 w1_ref, b1_ref, w2_ref, b2_ref,
                 q_ref, hT_ref, cT_ref,
                 hs_ref):
    """x_ref: (T*B, D) time-major rows (row index = t*B + b). hs_ref: (T*B, H) scratch."""
    TB, D = x_ref.shape
    B, H = h0_ref.shape
    T = TB // B

    # ---- Hoisted input projection: one matmul for all (t, b) rows ------------
    gates_x = jnp.dot(x_ref[...], wih_ref[...],
                      preferred_element_type=jnp.float32) + b_ref[...]   # (T*B, 4H)

    whh = whh_ref[...]                                                   # (H, 4H)
    h = h0_ref[...]                                                      # (B, H)
    c = c0_ref[...]                                                      # (B, H)

    # ---- Serial LSTM recurrence (T small & static -> fully unrolled) ---------
    for t in range(T):
        # Contiguous sublane-block slice of the precomputed input gates.
        gates = gates_x[t * B:(t + 1) * B, :] + jnp.dot(
            h, whh, preferred_element_type=jnp.float32)                  # (B, 4H)
        # Whole-vreg EUP activations, then slice per gate (PyTorch i,f,g,o order).
        sig = jax.nn.sigmoid(gates)
        tnh = jnp.tanh(gates)
        i_g = sig[:, 0 * H:1 * H]
        f_g = sig[:, 1 * H:2 * H]
        g_g = tnh[:, 2 * H:3 * H]
        o_g = sig[:, 3 * H:4 * H]

        c = f_g * c + i_g * g_g
        h = o_g * jnp.tanh(c)
        hs_ref[t * B:(t + 1) * B, :] = h            # contiguous store into history

    # Final hidden / cell state, written once.
    hT_ref[...] = h
    cT_ref[...] = c

    # ---- Batched fc1+ReLU and fc2 over all timesteps --------------------------
    hid = jnp.maximum(
        jnp.dot(hs_ref[...], w1_ref[...], preferred_element_type=jnp.float32)
        + b1_ref[...], 0.0)                                              # (T*B, FC1)
    q = jnp.dot(hid, w2_ref[...], preferred_element_type=jnp.float32) + b2_ref[...]
    q_ref[...] = q.astype(q_ref.dtype)                                   # (T*B, A)


def prepare_drqn_params(params):
    """One-time (per parameter update) kernel-ready layout: transposed weights,
    folded LSTM bias. Hoisted out of the per-call forward path."""
    H = HIDDEN
    return {
        "wih_t": jnp.transpose(params["w_ih"]).astype(jnp.float32),        # (D, 4H)
        "whh_t": jnp.transpose(params["w_hh"]).astype(jnp.float32),        # (H, 4H)
        "b_lstm": (params["b_ih"] + params["b_hh"]).reshape(1, 4 * H).astype(jnp.float32),
        "w1_t": jnp.transpose(params["w1"]).astype(jnp.float32),           # (H, FC1)
        "b1": params["b1"].reshape(1, FC1).astype(jnp.float32),
        "w2_t": jnp.transpose(params["w2"]).astype(jnp.float32),           # (FC1, A)
        "b2": params["b2"].reshape(1, -1).astype(jnp.float32),
    }


@jax.jit
def _forward_jit(x, h0, c0, prepared):
    """x: (B, T, D) f32; h0/c0: (B, H). Returns q (B, T, A), hT (B, H), cT (B, H)."""
    B, T, D = x.shape
    H = HIDDEN
    A = prepared["w2_t"].shape[1]

    # Time-major flat rows (row = t*B + b); metadata-level op on the HBM array.
    x_tm = jnp.transpose(x.astype(jnp.float32), (1, 0, 2)).reshape(T * B, D)

    def vmem():
        return pl.BlockSpec(memory_space=pltpu.MemorySpace.VMEM)

    q_tm, hT, cT = pl.pallas_call(
        _drqn_kernel,
        out_shape=(
            jax.ShapeDtypeStruct((T * B, A), jnp.float32),
            jax.ShapeDtypeStruct((B, H), jnp.float32),
            jax.ShapeDtypeStruct((B, H), jnp.float32),
        ),
        in_specs=[vmem() for _ in range(10)],
        out_specs=(vmem(), vmem(), vmem()),
        scratch_shapes=[pltpu.VMEM((T * B, H), jnp.float32)],
    )(x_tm, h0, c0,
      prepared["wih_t"], prepared["whh_t"], prepared["b_lstm"],
      prepared["w1_t"], prepared["b1"], prepared["w2_t"], prepared["b2"])

    # Un-flatten time-major q back to batch-first (B, T, A) outside the kernel.
    q = q_tm.reshape(T, B, A).transpose(1, 0, 2)
    return q, hT, cT


def drqn_forward(x, prepared, hidden=None):
    """x: (B, T, num_inputs). Returns (qvalue (B,T,A), (h (1,B,16), c (1,B,16)))."""
    B, T, D = x.shape
    H = HIDDEN
    if hidden is None:
        h0 = jnp.zeros((B, H), jnp.float32)
        c0 = jnp.zeros((B, H), jnp.float32)
    else:
        h0, c0 = hidden
        h0 = h0.reshape(B, H).astype(jnp.float32)
        c0 = c0.reshape(B, H).astype(jnp.float32)

    q, hT, cT = _forward_jit(x, h0, c0, prepared)
    return q, (hT[None], cT[None])


def init_drqn_params(key, num_inputs, num_outputs):
    """Parameter init mirroring the module's shapes.
    LSTM: uniform(-1/sqrt(H), 1/sqrt(H)); Linear weights: Xavier-uniform; biases small uniform."""
    H = HIDDEN
    ks = jax.random.split(key, 8)
    lstm_bound = 1.0 / jnp.sqrt(jnp.float32(H))

    def xavier(k, shape):  # (out, in)
        bound = jnp.sqrt(6.0 / (shape[0] + shape[1]))
        return jax.random.uniform(k, shape, jnp.float32, -bound, bound)

    return {
        "w_ih": jax.random.uniform(ks[0], (4 * H, num_inputs), jnp.float32,
                                   -lstm_bound, lstm_bound),
        "w_hh": jax.random.uniform(ks[1], (4 * H, H), jnp.float32,
                                   -lstm_bound, lstm_bound),
        "b_ih": jax.random.uniform(ks[2], (4 * H,), jnp.float32,
                                   -lstm_bound, lstm_bound),
        "b_hh": jax.random.uniform(ks[3], (4 * H,), jnp.float32,
                                   -lstm_bound, lstm_bound),
        "w1": xavier(ks[4], (FC1, H)),
        "b1": jax.random.uniform(ks[5], (FC1,), jnp.float32, -0.1, 0.1),
        "w2": xavier(ks[6], (num_outputs, FC1)),
        "b2": jax.random.uniform(ks[7], (num_outputs,), jnp.float32, -0.1, 0.1),
    }


def _ref_forward(x, params, h0, c0):
    """Pure-JAX reference of the PyTorch forward (for correctness checking)."""
    B, T, D = x.shape
    H = HIDDEN
    h = h0.reshape(B, H)
    c = c0.reshape(B, H)
    b = params["b_ih"] + params["b_hh"]
    outs = []
    for t in range(T):
        gates = x[:, t, :] @ params["w_ih"].T + h @ params["w_hh"].T + b
        i_g, f_g, g_g, o_g = jnp.split(gates, 4, axis=1)
        i_g = jax.nn.sigmoid(i_g)
        f_g = jax.nn.sigmoid(f_g)
        o_g = jax.nn.sigmoid(o_g)
        g_g = jnp.tanh(g_g)
        c = f_g * c + i_g * g_g
        h = o_g * jnp.tanh(c)
        outs.append(h)
    out = jnp.stack(outs, axis=1)                                # (B, T, H)
    hid = jax.nn.relu(out @ params["w1"].T + params["b1"])
    q = hid @ params["w2"].T + params["b2"]
    return q, h, c


if __name__ == "__main__":
    # Small shapes consistent with the DRQN module (CartPole-style POMDP).
    B, T, num_inputs, num_outputs = 2, 8, 4, 2

    key = jax.random.PRNGKey(0)
    k_param, k_x, k_h, k_c = jax.random.split(key, 4)

    params = init_drqn_params(k_param, num_inputs, num_outputs)
    prepared = prepare_drqn_params(params)          # hoisted, once per param update

    x = jax.random.normal(k_x, (B, T, num_inputs), jnp.float32)
    h0 = jax.random.normal(k_h, (1, B, HIDDEN), jnp.float32) * 0.1
    c0 = jax.random.normal(k_c, (1, B, HIDDEN), jnp.float32) * 0.1

    # Run once with an explicit hidden state and once with hidden=None (zeros).
    qvalue, (hT, cT) = drqn_forward(x, prepared, hidden=(h0, c0))
    qvalue2, _ = drqn_forward(x, prepared, hidden=None)
    jax.block_until_ready((qvalue, hT, cT, qvalue2))

    assert qvalue.shape == (B, T, num_outputs)
    assert hT.shape == (1, B, HIDDEN) and cT.shape == (1, B, HIDDEN)
    assert jnp.all(jnp.isfinite(qvalue)) and jnp.all(jnp.isfinite(hT))

    # Correctness vs. pure-JAX reference of the PyTorch forward.
    q_ref, h_ref, c_ref = _ref_forward(x, params, h0, c0)
    assert jnp.allclose(qvalue, q_ref, atol=1e-3, rtol=1e-3)
    assert jnp.allclose(hT[0], h_ref, atol=1e-3, rtol=1e-3)
    assert jnp.allclose(cT[0], c_ref, atol=1e-3, rtol=1e-3)

    # TODO(synk): the training path's pack_padded_sequence/pad_packed_sequence
    # (variable-length padding) is host-side bookkeeping, not part of this kernel.

    print("KERNEL_OK")
</pallas_src>

<mosaic_0001>
module attributes {stable_mosaic.version = 11 : i64} {
  func.func @_drqn_kernel(%arg0: memref<16x4xf32, #tpu.memory_space<vmem>>, %arg1: memref<2x16xf32, #tpu.memory_space<vmem>>, %arg2: memref<2x16xf32, #tpu.memory_space<vmem>>, %arg3: memref<4x64xf32, #tpu.memory_space<vmem>>, %arg4: memref<16x64xf32, #tpu.memory_space<vmem>>, %arg5: memref<1x64xf32, #tpu.memory_space<vmem>>, %arg6: memref<16x128xf32, #tpu.memory_space<vmem>>, %arg7: memref<1x128xf32, #tpu.memory_space<vmem>>, %arg8: memref<128x2xf32, #tpu.memory_space<vmem>>, %arg9: memref<1x2xf32, #tpu.memory_space<vmem>>, %arg10: memref<16x2xf32, #tpu.memory_space<vmem>>, %arg11: memref<2x16xf32, #tpu.memory_space<vmem>>, %arg12: memref<2x16xf32, #tpu.memory_space<vmem>>, %arg13: memref<16x16xf32, #tpu.memory_space<vmem>>) attributes {dimension_semantics = [], scalar_prefetch = 0 : i64, scratch_operands = 1 : i64, tpu.core_type = #tpu.core_type<tc>} {
    %c0 = arith.constant 0 : index
    %c0_0 = arith.constant 0 : index
    %0 = vector.load %arg0[%c0, %c0_0] : memref<16x4xf32, #tpu.memory_space<vmem>>, vector<16x4xf32>
    %c0_1 = arith.constant 0 : index
    %c0_2 = arith.constant 0 : index
    %1 = vector.load %arg3[%c0_1, %c0_2] : memref<4x64xf32, #tpu.memory_space<vmem>>, vector<4x64xf32>
    %cst = arith.constant dense<0.000000e+00> : vector<16x64xf32>
    %2 = tpu.matmul %0, %1, %cst {dimension_numbers = #tpu.dot_dimension_numbers<[1], [0], [0], [1], [0, 0, 1, 1], [], []>} : vector<16x4xf32>, vector<4x64xf32>, vector<16x64xf32> -> vector<16x64xf32>
    %c0_3 = arith.constant 0 : index
    %c0_4 = arith.constant 0 : index
    %3 = vector.load %arg5[%c0_3, %c0_4] : memref<1x64xf32, #tpu.memory_space<vmem>>, vector<1x64xf32>
    %4 = vector.broadcast %3 : vector<1x64xf32> to vector<16x64xf32>
    %5 = arith.addf %2, %4 : vector<16x64xf32>
    %c0_5 = arith.constant 0 : index
    %c0_6 = arith.constant 0 : index
    %6 = vector.load %arg4[%c0_5, %c0_6] : memref<16x64xf32, #tpu.memory_space<vmem>>, vector<16x64xf32>
    %c0_7 = arith.constant 0 : index
    %c0_8 = arith.constant 0 : index
    %7 = vector.load %arg1[%c0_7, %c0_8] : memref<2x16xf32, #tpu.memory_space<vmem>>, vector<2x16xf32>
    %c0_9 = arith.constant 0 : index
    %c0_10 = arith.constant 0 : index
    %8 = vector.load %arg2[%c0_9, %c0_10] : memref<2x16xf32, #tpu.memory_space<vmem>>, vector<2x16xf32>
    %9 = vector.extract_strided_slice %5 {offsets = [0, 0], sizes = [2, 64], strides = [1, 1]} : vector<16x64xf32> to vector<2x64xf32>
    %cst_11 = arith.constant dense<0.000000e+00> : vector<2x64xf32>
    %10 = tpu.matmul %7, %6, %cst_11 {dimension_numbers = #tpu.dot_dimension_numbers<[1], [0], [0], [1], [0, 0, 1, 1], [], []>} : vector<2x16xf32>, vector<16x64xf32>, vector<2x64xf32> -> vector<2x64xf32>
    %11 = arith.addf %9, %10 : vector<2x64xf32>
    %12 = arith.negf %11 : vector<2x64xf32>
    %13 = math.exp %12 : vector<2x64xf32>
    %cst_12 = arith.constant 1.000000e+00 : f32
    %14 = vector.broadcast %cst_12 : f32 to vector<2x64xf32>
    %15 = arith.addf %14, %13 : vector<2x64xf32>
    %16 = arith.divf %14, %15 : vector<2x64xf32>
    %17 = math.tanh %11 : vector<2x64xf32>
    %18 = vector.extract_strided_slice %16 {offsets = [0, 0], sizes = [2, 16], strides = [1, 1]} : vector<2x64xf32> to vector<2x16xf32>
    %19 = vector.extract_strided_slice %16 {offsets = [0, 16], sizes = [2, 16], strides = [1, 1]} : vector<2x64xf32> to vector<2x16xf32>
    %20 = vector.extract_strided_slice %17 {offsets = [0, 32], sizes = [2, 16], strides = [1, 1]} : vector<2x64xf32> to vector<2x16xf32>
    %21 = vector.extract_strided_slice %16 {offsets = [0, 48], sizes = [2, 16], strides = [1, 1]} : vector<2x64xf32> to vector<2x16xf32>
    %22 = arith.mulf %19, %8 : vector<2x16xf32>
    %23 = arith.mulf %18, %20 : vector<2x16xf32>
    %24 = arith.addf %22, %23 : vector<2x16xf32>
    %25 = math.tanh %24 : vector<2x16xf32>
    %26 = arith.mulf %21, %25 : vector<2x16xf32>
    %c0_13 = arith.constant 0 : index
    %c0_14 = arith.constant 0 : index
    %27 = vector.load %arg13[%c0_13, %c0_14] : memref<16x16xf32, #tpu.memory_space<vmem>>, vector<2x16xf32>
    tpu.vector_store %arg13[%c0_13, %c0_14], %26 {strides = array<i32>} : memref<16x16xf32, #tpu.memory_space<vmem>>, vector<2x16xf32>,
    %28 = vector.extract_strided_slice %5 {offsets = [2, 0], sizes = [2, 64], strides = [1, 1]} : vector<16x64xf32> to vector<2x64xf32>
    %cst_15 = arith.constant dense<0.000000e+00> : vector<2x64xf32>
    %29 = tpu.matmul %26, %6, %cst_15 {dimension_numbers = #tpu.dot_dimension_numbers<[1], [0], [0], [1], [0, 0, 1, 1], [], []>} : vector<2x16xf32>, vector<16x64xf32>, vector<2x64xf32> -> vector<2x64xf32>
    %30 = arith.addf %28, %29 : vector<2x64xf32>
    %31 = arith.negf %30 : vector<2x64xf32>
    %32 = math.exp %31 : vector<2x64xf32>
    %cst_16 = arith.constant 1.000000e+00 : f32
    %33 = vector.broadcast %cst_16 : f32 to vector<2x64xf32>
    %34 = arith.addf %33, %32 : vector<2x64xf32>
    %35 = arith.divf %33, %34 : vector<2x64xf32>
    %36 = math.tanh %30 : vector<2x64xf32>
    %37 = vector.extract_strided_slice %35 {offsets = [0, 0], sizes = [2, 16], strides = [1, 1]} : vector<2x64xf32> to vector<2x16xf32>
    %38 = vector.extract_strided_slice %35 {offsets = [0, 16], sizes = [2, 16], strides = [1, 1]} : vector<2x64xf32> to vector<2x16xf32>
    %39 = vector.extract_strided_slice %36 {offsets = [0, 32], sizes = [2, 16], strides = [1, 1]} : vector<2x64xf32> to vector<2x16xf32>
    %40 = vector.extract_strided_slice %35 {offsets = [0, 48], sizes = [2, 16], strides = [1, 1]} : vector<2x64xf32> to vector<2x16xf32>
    %41 = arith.mulf %38, %24 : vector<2x16xf32>
    %42 = arith.mulf %37, %39 : vector<2x16xf32>
    %43 = arith.addf %41, %42 : vector<2x16xf32>
    %44 = math.tanh %43 : vector<2x16xf32>
    %45 = arith.mulf %40, %44 : vector<2x16xf32>
    %c2 = arith.constant 2 : index
    %c0_17 = arith.constant 0 : index
    %46 = vector.load %arg13[%c2, %c0_17] : memref<16x16xf32, #tpu.memory_space<vmem>>, vector<2x16xf32>
    tpu.vector_store %arg13[%c2, %c0_17], %45 {strides = array<i32>} : memref<16x16xf32, #tpu.memory_space<vmem>>, vector<2x16xf32>,
    %47 = vector.extract_strided_slice %5 {offsets = [4, 0], sizes = [2, 64], strides = [1, 1]} : vector<16x64xf32> to vector<2x64xf32>
    %cst_18 = arith.constant dense<0.000000e+00> : vector<2x64xf32>
    %48 = tpu.matmul %45, %6, %cst_18 {dimension_numbers = #tpu.dot_dimension_numbers<[1], [0], [0], [1], [0, 0, 1, 1], [], []>} : vector<2x16xf32>, vector<16x64xf32>, vector<2x64xf32> -> vector<2x64xf32>
    %49 = arith.addf %47, %48 : vector<2x64xf32>
    %50 = arith.negf %49 : vector<2x64xf32>
    %51 = math.exp %50 : vector<2x64xf32>
    %cst_19 = arith.constant 1.000000e+00 : f32
    %52 = vector.broadcast %cst_19 : f32 to vector<2x64xf32>
    %53 = arith.addf %52, %51 : vector<2x64xf32>
    %54 = arith.divf %52, %53 : vector<2x64xf32>
    %55 = math.tanh %49 : vector<2x64xf32>
    %56 = vector.extract_strided_slice %54 {offsets = [0, 0], sizes = [2, 16], strides = [1, 1]} : vector<2x64xf32> to vector<2x16xf32>
    %57 = vector.extract_strided_slice %54 {offsets = [0, 16], sizes = [2, 16], strides = [1, 1]} : vector<2x64xf32> to vector<2x16xf32>
    %58 = vector.extract_strided_slice %55 {offsets = [0, 32], sizes = [2, 16], strides = [1, 1]} : vector<2x64xf32> to vector<2x16xf32>
    %59 = vector.extract_strided_slice %54 {offsets = [0, 48], sizes = [2, 16], strides = [1, 1]} : vector<2x64xf32> to vector<2x16xf32>
    %60 = arith.mulf %57, %43 : vector<2x16xf32>
    %61 = arith.mulf %56, %58 : vector<2x16xf32>
    %62 = arith.addf %60, %61 : vector<2x16xf32>
    %63 = math.tanh %62 : vector<2x16xf32>
    %64 = arith.mulf %59, %63 : vector<2x16xf32>
    %c4 = arith.constant 4 : index
    %c0_20 = arith.constant 0 : index
    %65 = vector.load %arg13[%c4, %c0_20] : memref<16x16xf32, #tpu.memory_space<vmem>>, vector<2x16xf32>
    tpu.vector_store %arg13[%c4, %c0_20], %64 {strides = array<i32>} : memref<16x16xf32, #tpu.memory_space<vmem>>, vector<2x16xf32>,
    %66 = vector.extract_strided_slice %5 {offsets = [6, 0], sizes = [2, 64], strides = [1, 1]} : vector<16x64xf32> to vector<2x64xf32>
    %cst_21 = arith.constant dense<0.000000e+00> : vector<2x64xf32>
    %67 = tpu.matmul %64, %6, %cst_21 {dimension_numbers = #tpu.dot_dimension_numbers<[1], [0], [0], [1], [0, 0, 1, 1], [], []>} : vector<2x16xf32>, vector<16x64xf32>, vector<2x64xf32> -> vector<2x64xf32>
    %68 = arith.addf %66, %67 : vector<2x64xf32>
    %69 = arith.negf %68 : vector<2x64xf32>
    %70 = math.exp %69 : vector<2x64xf32>
    %cst_22 = arith.constant 1.000000e+00 : f32
    %71 = vector.broadcast %cst_22 : f32 to vector<2x64xf32>
    %72 = arith.addf %71, %70 : vector<2x64xf32>
    %73 = arith.divf %71, %72 : vector<2x64xf32>
    %74 = math.tanh %68 : vector<2x64xf32>
    %75 = vector.extract_strided_slice %73 {offsets = [0, 0], sizes = [2, 16], strides = [1, 1]} : vector<2x64xf32> to vector<2x16xf32>
    %76 = vector.extract_strided_slice %73 {offsets = [0, 16], sizes = [2, 16], strides = [1, 1]} : vector<2x64xf32> to vector<2x16xf32>
    %77 = vector.extract_strided_slice %74 {offsets = [0, 32], sizes = [2, 16], strides = [1, 1]} : vector<2x64xf32> to vector<2x16xf32>
    %78 = vector.extract_strided_slice %73 {offsets = [0, 48], sizes = [2, 16], strides = [1, 1]} : vector<2x64xf32> to vector<2x16xf32>
    %79 = arith.mulf %76, %62 : vector<2x16xf32>
    %80 = arith.mulf %75, %77 : vector<2x16xf32>
    %81 = arith.addf %79, %80 : vector<2x16xf32>
    %82 = math.tanh %81 : vector<2x16xf32>
    %83 = arith.mulf %78, %82 : vector<2x16xf32>
    %c6 = arith.constant 6 : index
    %c0_23 = arith.constant 0 : index
    %84 = vector.load %arg13[%c6, %c0_23] : memref<16x16xf32, #tpu.memory_space<vmem>>, vector<2x16xf32>
    tpu.vector_store %arg13[%c6, %c0_23], %83 {strides = array<i32>} : memref<16x16xf32, #tpu.memory_space<vmem>>, vector<2x16xf32>,
    %85 = vector.extract_strided_slice %5 {offsets = [8, 0], sizes = [2, 64], strides = [1, 1]} : vector<16x64xf32> to vector<2x64xf32>
    %cst_24 = arith.constant dense<0.000000e+00> : vector<2x64xf32>
    %86 = tpu.matmul %83, %6, %cst_24 {dimension_numbers = #tpu.dot_dimension_numbers<[1], [0], [0], [1], [0, 0, 1, 1], [], []>} : vector<2x16xf32>, vector<16x64xf32>, vector<2x64xf32> -> vector<2x64xf32>
    %87 = arith.addf %85, %86 : vector<2x64xf32>
    %88 = arith.negf %87 : vector<2x64xf32>
    %89 = math.exp %88 : vector<2x64xf32>
    %cst_25 = arith.constant 1.000000e+00 : f32
    %90 = vector.broadcast %cst_25 : f32 to vector<2x64xf32>
    %91 = arith.addf %90, %89 : vector<2x64xf32>
    %92 = arith.divf %90, %91 : vector<2x64xf32>
    %93 = math.tanh %87 : vector<2x64xf32>
    %94 = vector.extract_strided_slice %92 {offsets = [0, 0], sizes = [2, 16], strides = [1, 1]} : vector<2x64xf32> to vector<2x16xf32>
    %95 = vector.extract_strided_slice %92 {offsets = [0, 16], sizes = [2, 16], strides = [1, 1]} : vector<2x64xf32> to vector<2x16xf32>
    %96 = vector.extract_strided_slice %93 {offsets = [0, 32], sizes = [2, 16], strides = [1, 1]} : vector<2x64xf32> to vector<2x16xf32>
    %97 = vector.extract_strided_slice %92 {offsets = [0, 48], sizes = [2, 16], strides = [1, 1]} : vector<2x64xf32> to vector<2x16xf32>
    %98 = arith.mulf %95, %81 : vector<2x16xf32>
    %99 = arith.mulf %94, %96 : vector<2x16xf32>
    %100 = arith.addf %98, %99 : vector<2x16xf32>
    %101 = math.tanh %100 : vector<2x16xf32>
    %102 = arith.mulf %97, %101 : vector<2x16xf32>
    %c8 = arith.constant 8 : index
    %c0_26 = arith.constant 0 : index
    %103 = vector.load %arg13[%c8, %c0_26] : memref<16x16xf32, #tpu.memory_space<vmem>>, vector<2x16xf32>
    tpu.vector_store %arg13[%c8, %c0_26], %102 {strides = array<i32>} : memref<16x16xf32, #tpu.memory_space<vmem>>, vector<2x16xf32>,
    %104 = vector.extract_strided_slice %5 {offsets = [10, 0], sizes = [2, 64], strides = [1, 1]} : vector<16x64xf32> to vector<2x64xf32>
    %cst_27 = arith.constant dense<0.000000e+00> : vector<2x64xf32>
    %105 = tpu.matmul %102, %6, %cst_27 {dimension_numbers = #tpu.dot_dimension_numbers<[1], [0], [0], [1], [0, 0, 1, 1], [], []>} : vector<2x16xf32>, vector<16x64xf32>, vector<2x64xf32> -> vector<2x64xf32>
    %106 = arith.addf %104, %105 : vector<2x64xf32>
    %107 = arith.negf %106 : vector<2x64xf32>
    %108 = math.exp %107 : vector<2x64xf32>
    %cst_28 = arith.constant 1.000000e+00 : f32
    %109 = vector.broadcast %cst_28 : f32 to vector<2x64xf32>
    %110 = arith.addf %109, %108 : vector<2x64xf32>
    %111 = arith.divf %109, %110 : vector<2x64xf32>
    %112 = math.tanh %106 : vector<2x64xf32>
    %113 = vector.extract_strided_slice %111 {offsets = [0, 0], sizes = [2, 16], strides = [1, 1]} : vector<2x64xf32> to vector<2x16xf32>
    %114 = vector.extract_strided_slice %111 {offsets = [0, 16], sizes = [2, 16], strides = [1, 1]} : vector<2x64xf32> to vector<2x16xf32>
    %115 = vector.extract_strided_slice %112 {offsets = [0, 32], sizes = [2, 16], strides = [1, 1]} : vector<2x64xf32> to vector<2x16xf32>
    %116 = vector.extract_strided_slice %111 {offsets = [0, 48], sizes = [2, 16], strides = [1, 1]} : vector<2x64xf32> to vector<2x16xf32>
    %117 = arith.mulf %114, %100 : vector<2x16xf32>
    %118 = arith.mulf %113, %115 : vector<2x16xf32>
    %119 = arith.addf %117, %118 : vector<2x16xf32>
    %120 = math.tanh %119 : vector<2x16xf32>
    %121 = arith.mulf %116, %120 : vector<2x16xf32>
    %c10 = arith.constant 10 : index
    %c0_29 = arith.constant 0 : index
    %122 = vector.load %arg13[%c10, %c0_29] : memref<16x16xf32, #tpu.memory_space<vmem>>, vector<2x16xf32>
    tpu.vector_store %arg13[%c10, %c0_29], %121 {strides = array<i32>} : memref<16x16xf32, #tpu.memory_space<vmem>>, vector<2x16xf32>,
    %123 = vector.extract_strided_slice %5 {offsets = [12, 0], sizes = [2, 64], strides = [1, 1]} : vector<16x64xf32> to vector<2x64xf32>
    %cst_30 = arith.constant dense<0.000000e+00> : vector<2x64xf32>
    %124 = tpu.matmul %121, %6, %cst_30 {dimension_numbers = #tpu.dot_dimension_numbers<[1], [0], [0], [1], [0, 0, 1, 1], [], []>} : vector<2x16xf32>, vector<16x64xf32>, vector<2x64xf32> -> vector<2x64xf32>
    %125 = arith.addf %123, %124 : vector<2x64xf32>
    %126 = arith.negf %125 : vector<2x64xf32>
    %127 = math.exp %126 : vector<2x64xf32>
    %cst_31 = arith.constant 1.000000e+00 : f32
    %128 = vector.broadcast %cst_31 : f32 to vector<2x64xf32>
    %129 = arith.addf %128, %127 : vector<2x64xf32>
    %130 = arith.divf %128, %129 : vector<2x64xf32>
    %131 = math.tanh %125 : vector<2x64xf32>
    %132 = vector.extract_strided_slice %130 {offsets = [0, 0], sizes = [2, 16], strides = [1, 1]} : vector<2x64xf32> to vector<2x16xf32>
    %133 = vector.extract_strided_slice %130 {offsets = [0, 16], sizes = [2, 16], strides = [1, 1]} : vector<2x64xf32> to vector<2x16xf32>
    %134 = vector.extract_strided_slice %131 {offsets = [0, 32], sizes = [2, 16], strides = [1, 1]} : vector<2x64xf32> to vector<2x16xf32>
    %135 = vector.extract_strided_slice %130 {offsets = [0, 48], sizes = [2, 16], strides = [1, 1]} : vector<2x64xf32> to vector<2x16xf32>
    %136 = arith.mulf %133, %119 : vector<2x16xf32>
    %137 = arith.mulf %132, %134 : vector<2x16xf32>
    %138 = arith.addf %136, %137 : vector<2x16xf32>
    %139 = math.tanh %138 : vector<2x16xf32>
    %140 = arith.mulf %135, %139 : vector<2x16xf32>
    %c12 = arith.constant 12 : index
    %c0_32 = arith.constant 0 : index
    %141 = vector.load %arg13[%c12, %c0_32] : memref<16x16xf32, #tpu.memory_space<vmem>>, vector<2x16xf32>
    tpu.vector_store %arg13[%c12, %c0_32], %140 {strides = array<i32>} : memref<16x16xf32, #tpu.memory_space<vmem>>, vector<2x16xf32>,
    %142 = vector.extract_strided_slice %5 {offsets = [14, 0], sizes = [2, 64], strides = [1, 1]} : vector<16x64xf32> to vector<2x64xf32>
    %cst_33 = arith.constant dense<0.000000e+00> : vector<2x64xf32>
    %143 = tpu.matmul %140, %6, %cst_33 {dimension_numbers = #tpu.dot_dimension_numbers<[1], [0], [0], [1], [0, 0, 1, 1], [], []>} : vector<2x16xf32>, vector<16x64xf32>, vector<2x64xf32> -> vector<2x64xf32>
    %144 = arith.addf %142, %143 : vector<2x64xf32>
    %145 = arith.negf %144 : vector<2x64xf32>
    %146 = math.exp %145 : vector<2x64xf32>
    %cst_34 = arith.constant 1.000000e+00 : f32
    %147 = vector.broadcast %cst_34 : f32 to vector<2x64xf32>
    %148 = arith.addf %147, %146 : vector<2x64xf32>
    %149 = arith.divf %147, %148 : vector<2x64xf32>
    %150 = math.tanh %144 : vector<2x64xf32>
    %151 = vector.extract_strided_slice %149 {offsets = [0, 0], sizes = [2, 16], strides = [1, 1]} : vector<2x64xf32> to vector<2x16xf32>
    %152 = vector.extract_strided_slice %149 {offsets = [0, 16], sizes = [2, 16], strides = [1, 1]} : vector<2x64xf32> to vector<2x16xf32>
    %153 = vector.extract_strided_slice %150 {offsets = [0, 32], sizes = [2, 16], strides = [1, 1]} : vector<2x64xf32> to vector<2x16xf32>
    %154 = vector.extract_strided_slice %149 {offsets = [0, 48], sizes = [2, 16], strides = [1, 1]} : vector<2x64xf32> to vector<2x16xf32>
    %155 = arith.mulf %152, %138 : vector<2x16xf32>
    %156 = arith.mulf %151, %153 : vector<2x16xf32>
    %157 = arith.addf %155, %156 : vector<2x16xf32>
    %158 = math.tanh %157 : vector<2x16xf32>
    %159 = arith.mulf %154, %158 : vector<2x16xf32>
    %c14 = arith.constant 14 : index
    %c0_35 = arith.constant 0 : index
    %160 = vector.load %arg13[%c14, %c0_35] : memref<16x16xf32, #tpu.memory_space<vmem>>, vector<2x16xf32>
    tpu.vector_store %arg13[%c14, %c0_35], %159 {strides = array<i32>} : memref<16x16xf32, #tpu.memory_space<vmem>>, vector<2x16xf32>,
    %c0_36 = arith.constant 0 : index
    %c0_37 = arith.constant 0 : index
    %161 = vector.load %arg11[%c0_36, %c0_37] : memref<2x16xf32, #tpu.memory_space<vmem>>, vector<2x16xf32>
    tpu.vector_store %arg11[%c0_36, %c0_37], %159 {strides = array<i32>} : memref<2x16xf32, #tpu.memory_space<vmem>>, vector<2x16xf32>,
    %c0_38 = arith.constant 0 : index
    %c0_39 = arith.constant 0 : index
    %162 = vector.load %arg12[%c0_38, %c0_39] : memref<2x16xf32, #tpu.memory_space<vmem>>, vector<2x16xf32>
    tpu.vector_store %arg12[%c0_38, %c0_39], %157 {strides = array<i32>} : memref<2x16xf32, #tpu.memory_space<vmem>>, vector<2x16xf32>,
    %c0_40 = arith.constant 0 : index
    %c0_41 = arith.constant 0 : index
    %163 = vector.load %arg13[%c0_40, %c0_41] : memref<16x16xf32, #tpu.memory_space<vmem>>, vector<16x16xf32>
    %c0_42 = arith.constant 0 : index
    %c0_43 = arith.constant 0 : index
    %164 = vector.load %arg6[%c0_42, %c0_43] : memref<16x128xf32, #tpu.memory_space<vmem>>, vector<16x128xf32>
    %cst_44 = arith.constant dense<0.000000e+00> : vector<16x128xf32>
    %165 = tpu.matmul %163, %164, %cst_44 {dimension_numbers = #tpu.dot_dimension_numbers<[1], [0], [0], [1], [0, 0, 1, 1], [], []>} : vector<16x16xf32>, vector<16x128xf32>, vector<16x128xf32> -> vector<16x128xf32>
    %c0_45 = arith.constant 0 : index
    %c0_46 = arith.constant 0 : index
    %166 = vector.load %arg7[%c0_45, %c0_46] : memref<1x128xf32, #tpu.memory_space<vmem>>, vector<1x128xf32>
    %167 = vector.broadcast %166 : vector<1x128xf32> to vector<16x128xf32>
    %168 = arith.addf %165, %167 : vector<16x128xf32>
    %cst_47 = arith.constant 0.000000e+00 : f32
    %169 = vector.broadcast %cst_47 : f32 to vector<16x128xf32>
    %170 = arith.maximumf %168, %169 : vector<16x128xf32>
    %c0_48 = arith.constant 0 : index
    %c0_49 = arith.constant 0 : index
    %171 = vector.load %arg8[%c0_48, %c0_49] : memref<128x2xf32, #tpu.memory_space<vmem>>, vector<128x2xf32>
    %cst_50 = arith.constant dense<0.000000e+00> : vector<16x2xf32>
    %172 = tpu.matmul %170, %171, %cst_50 {dimension_numbers = #tpu.dot_dimension_numbers<[1], [0], [0], [1], [0, 0, 1, 1], [], []>} : vector<16x128xf32>, vector<128x2xf32>, vector<16x2xf32> -> vector<16x2xf32>
    %c0_51 = arith.constant 0 : index
    %c0_52 = arith.constant 0 : index
    %173 = vector.load %arg9[%c0_51, %c0_52] : memref<1x2xf32, #tpu.memory_space<vmem>>, vector<1x2xf32>
    %174 = vector.broadcast %173 : vector<1x2xf32> to vector<16x2xf32>
    %175 = arith.addf %172, %174 : vector<16x2xf32>
    %c0_53 = arith.constant 0 : index
    %c0_54 = arith.constant 0 : index
    %176 = vector.load %arg10[%c0_53, %c0_54] : memref<16x2xf32, #tpu.memory_space<vmem>>, vector<16x2xf32>
    tpu.vector_store %arg10[%c0_53, %c0_54], %175 {strides = array<i32>} : memref<16x2xf32, #tpu.memory_space<vmem>>, vector<16x2xf32>,
    return
  }
}

</mosaic_0001>

<bundles_post_ra>
// kernel: _forward_jit.1
= control target key start
LH: loop header
LB: loop body
LE: loop exit
PB: predicated region body
PF: predicated region fallthrough
CT: control target
= control target key end

     0   :  { %18 = vsyncpa [#allocation4], 0  ;;  %vm54_vm0 = vcmask 1043456   ;;  %vm47_vm1 = vcmask 31744   ;;  %vm85_vm2 = vcmask 130048   ;;  %s1218_s0 = inlined_call_operand.vmem [shape: f32[16,4], index: 0, kind: input, shape index: {}]   ;;  %s1219_s1 = inlined_call_operand.vmem [shape: f32[2,16], index: 1, kind: input, shape index: {}]   ;;  %s1220_s2 = inlined_call_operand.vmem [shape: f32[2,16], index: 2, kind: input, shape index: {}]   ;;  %s1221_s3 = inlined_call_operand.vmem [shape: f32[4,64], index: 3, kind: input, shape index: {}]   ;;  %s1222_s4 = inlined_call_operand.vmem [shape: f32[16,64], index: 4, kind: input, shape index: {}]   ;;  %s1223_s5 = inlined_call_operand.vmem [shape: f32[1,64], index: 5, kind: input, shape index: {}]   ;;  %s1224_s6 = inlined_call_operand.vmem [shape: f32[16,128], index: 6, kind: input, shape index: {}]   ;;  %s1225_s7 = inlined_call_operand.vmem [shape: f32[1,128], index: 7, kind: input, shape index: {}]   ;;  %s1226_s8 = inlined_call_operand.vmem [shape: f32[128,2], index: 8, kind: input, shape index: {}]   ;;  %s1227_s9 = inlined_call_operand.vmem [shape: f32[1,2], index: 9, kind: input, shape index: {}]   ;;  %s1228_s10 = inlined_call_operand.vmem [shape: f32[16,2], index: 10, kind: output, shape index: {0}]   ;;  %s1229_s11 = inlined_call_operand.hbm [shape: f32[2,16], index: 11, kind: output, shape index: {1}]   ;;  %s1230_s12 = inlined_call_operand.hbm [shape: f32[2,16], index: 12, kind: output, shape index: {2}]  }
   0x1   :  { %v42_v0 = vld [vmem:[%s1221_s3] sm:$0xf]  ;;  %v1021_v1 = vld [vmem:[%s1222_s4 + $0x8] sm:$0xff] }
   0x2   :  { %v40_v2 = vld [vmem:[%s1218_s0] sm:$0xff]  ;;  %796 = vmatpush.msk.msra.mxu0 %vm54_vm0, %v42_v0  ;;  %103 = vmatpush.msra.mxu1 %v1021_v1 }
   0x3   :  { %v1030_v3 = vld [vmem:[%s1222_s4] sm:$0xff]  ;;  %797 = vmatmul.msk.f32.vlgmr.msra.gmra.mxu0 %vm47_vm1, %v40_v2  ;;  %173 = vmatpush.msra.mxu2 %v1021_v1 }
   0x4   :  { %v83_v4 = vld [vmem:[%s1219_s1] sm:$0x3]  ;;  %104 = vmatpush.msra.mxu1 %v1030_v3  ;;  %248 = vmatpush.msrb.mxu0 %v1021_v1 }
   0x5   :  { %19 = vsyncpa [#allocation6], 0  ;;  %799 = vmatmul.msk.f32.vlgmr.msra.gmra.mxu1 %vm85_vm2, %v83_v4  ;;  %174 = vmatpush.msra.mxu2 %v1030_v3  ;;  %v1053_v5 = vld [vmem:[%s1223_s5] ss:$0 sm:$0xff]  ;;  %s943_s30 = smov 96   ;;  %s944_s15 = smov 16  }
   0x6   :  { %249 = vmatpush.msrb.mxu0 %v1030_v3  ;;  %323 = vmatpush.msrb.mxu1 %v1021_v1  ;;  %v84_v11 = vld [vmem:[%s1220_s2] sm:$0x3]  ;;  %s945_s2 = smov 32   ;;  %s946_s5 = smov 80   ;;  %vm155_vm7 = vcmask 123904   ;;  %v41_v59 = vld [vmem:[%s1218_s0 + $0x8] sm:$0xff] }
   0x7   :  { %398 = vmatpush.msrb.mxu2 %v1021_v1  ;;  %s947_s0 = smov 112   ;;  %s948_s29 = smov [#allocation3]  }
   0x8   :  { %540 = vmatpush.msra.mxu0 %v1021_v1  ;;  %324 = vmatpush.msrb.mxu1 %v1030_v3  ;;  %s767_s1 = sshll.u32 %s948_s29, 4  ;;  %s949_s13 = smov [#allocation5]   ;;  %s768_s1 = int_to_ptr.vmem [resolvable:$true] %s767_s1 }
   0x9   :  { %399 = vmatpush.msrb.mxu2 %v1030_v3  ;;  %s778_s14 = sshll.u32 %s949_s13, 4  ;;  %s779_s14 = int_to_ptr.vmem [resolvable:$true] %s778_s14 }
   0xa   :  { %466 = vmatpush.msra.mxu1 %v1021_v1  ;;  %541 = vmatpush.msra.mxu0 %v1030_v3 }
   0xb   :  { %798 = vmatmul.msk.f32.gmra.mxu0 %vm47_vm1, %v41_v59 }
   0xc   :  { %467 = vmatpush.msra.mxu1 %v1030_v3 }
  0x80   :  { %v75_v6 = vpop.f32.mrf.mxu0 }
  0x81   :  { %v1056_v7 = vadd.f32 %v1053_v5, %v75_v6 }
  0x82   :  { %v106_v8 = vpop.f32.mrf.mxu1 }
  0x83   :  { %v109_v9 = vadd.f32 %v106_v8, %v1056_v7 }
  0x85   :  { %827 = vtanh.f32 %v109_v9  ;;  %v800_v12 = vmul.f32 -1.442695, %v109_v9 }
  0x87   :  { %829 = vpow2.f32 %v800_v12 }
  0x88   :  { %v1082_v0 = vpop.f32.mrf.mxu0 }
  0x8b   :  { %v828_v10 = vpop.eup %827 }
  0x8c   :  { %136 = vrot.lane.b32.xlu0 %v828_v10, %s943_s30 }
  0x8d   :  { %v830_v13 = vpop.eup %829 }
  0x8e   :  { %v113_v14 = vadd.f32 1.0, %v830_v13 }
  0x90   :  { %831 = vrcp.f32 %v113_v14  ;;  %v125_v20 = vand.u32 2147483648, %v113_v14  ;;  %vm119_vm4 = vweird.f32 %v113_v14  ;;  %v123_v21 = vand.u32 2147483647, %v113_v14 }
  0x92   :  { %v126_v23 = vor.u32 1.1754944e-38, %v125_v20  ;;  %vm124_vm6 = vcmp.eq.f32.partialorder %v123_v21, 8.507059e+37 }
  0x94   :  { %131 = vrot.lane.b32.xlu0 %v84_v11, %s944_s15 }
  0x96   :  { %v832_v15 = vpop.eup %831 }
  0x97   :  { %v115_v16 = vmul.f32 %v832_v15, %v113_v14  ;;  %vm120_vm3 = vweird.f32 %v832_v15 }
  0x98   :  { %vm121_vm5 = vmor %vm119_vm4, %vm120_vm3 }
  0x99   :  { %v116_v17 = vsub.f32 1.0, %v115_v16 }
  0x9b   :  { %v117_v18 = vmul.f32 %v832_v15, %v116_v17 }
  0x9d   :  { %v118_v19 = vadd.f32 %v832_v15, %v117_v18 }
  0x9f   :  { %v122_v22 = vsel %vm121_vm5, %v832_v15, %v118_v19 }
  0xa0   :  { %v127_v25 = vsel %vm124_vm6, %v126_v23, %v122_v22 }
  0xfe   :  { %v137_v24 = vpop.permute.xlu0 %136 }
  0xff   :  { %v139_v26 = vmul.f32 %v137_v24, %v127_v25 }
 0x101   :  { %141 = vrot.lane.b32.xlu1 %v139_v26, %s944_s15 }
 0x106   :  { %v132_v27 = vpop.permute.xlu0 %131 }
 0x107   :  { %v134_v28 = vmul.f32 %v132_v27, %v127_v25 }
 0x173   :  { %v142_v29 = vpop.permute.xlu1 %141 }
 0x174   :  { %v144_v30 = vadd.f32 %v142_v29, %v134_v28 }
 0x176   :  { %833 = vtanh.f32 %v144_v30  ;;  %v204_v54 = vrot.slane %v144_v30, 6 }
 0x17c   :  { %v834_v31 = vpop.eup %833 }
 0x17d   :  { %147 = vrot.lane.b32.xlu1 %v834_v31, %s945_s2 }
 0x1ef   :  { %v148_v32 = vpop.permute.xlu1 %147 }
 0x1f0   :  { %v150_v33 = vmul.f32 %v148_v32, %v127_v25 }
 0x1f2   :  { %152 = vrot.lane.b32.xlu2 %v150_v33, %s946_s5 }
 0x24c   :  { %v153_v34 = vpop.permute.xlu2 %152 }
 0x24d   :  { %156 = vst.msk [vmem:[#allocation2] sm:$0x3] %vm155_vm7, %v153_v34  ;;  %801 = vmatmul.msk.f32.vlgmr.msra.gmra.mxu2 %vm85_vm2, %v153_v34 }
 0x2d0   :  { %v176_v35 = vpop.f32.mrf.mxu2 }
 0x2d1   :  { %v180_v36 = vrot.slane %v176_v35, 6 }
 0x2d3   :  { %v182_v37 = vadd.f32 %v180_v36, %v1056_v7 }
 0x2d5   :  { %835 = vtanh.f32 %v182_v37  ;;  %v802_v39 = vmul.f32 -1.442695, %v182_v37 }
 0x2d7   :  { %837 = vpow2.f32 %v802_v39 }
 0x2db   :  { %v836_v38 = vpop.eup %835 }
 0x2dc   :  { %208 = vrot.lane.b32.xlu2 %v836_v38, %s943_s30 }
 0x2dd   :  { %v838_v40 = vpop.eup %837 }
 0x2de   :  { %v186_v41 = vadd.f32 1.0, %v838_v40 }
 0x2e0   :  { %839 = vrcp.f32 %v186_v41  ;;  %v198_v47 = vand.u32 2147483648, %v186_v41  ;;  %vm192_vm9 = vweird.f32 %v186_v41  ;;  %v196_v48 = vand.u32 2147483647, %v186_v41 }
 0x2e2   :  { %v199_v50 = vor.u32 1.1754944e-38, %v198_v47  ;;  %vm197_vm11 = vcmp.eq.f32.partialorder %v196_v48, 8.507059e+37 }
 0x2e6   :  { %v840_v42 = vpop.eup %839 }
 0x2e7   :  { %v188_v43 = vmul.f32 %v840_v42, %v186_v41  ;;  %vm193_vm8 = vweird.f32 %v840_v42 }
 0x2e8   :  { %vm194_vm10 = vmor %vm192_vm9, %vm193_vm8 }
 0x2e9   :  { %v189_v44 = vsub.f32 1.0, %v188_v43 }
 0x2eb   :  { %v190_v45 = vmul.f32 %v840_v42, %v189_v44 }
 0x2ed   :  { %v191_v46 = vadd.f32 %v840_v42, %v190_v45 }
 0x2ef   :  { %v195_v49 = vsel %vm194_vm10, %v840_v42, %v191_v46 }
 0x2f0   :  { %v200_v52 = vsel %vm197_vm11, %v199_v50, %v195_v49 }
 0x2f1   :  { %v206_v55 = vmul.f32 %v204_v54, %v200_v52 }
 0x336   :  { %v209_v51 = vpop.permute.xlu2 %208 }
 0x337   :  { %v211_v53 = vmul.f32 %v209_v51, %v200_v52 }
 0x339   :  { %213 = vrot.lane.b32.xlu0 %v211_v53, %s944_s15 }
 0x3ab   :  { %v214_v56 = vpop.permute.xlu0 %213 }
 0x3ac   :  { %v216_v57 = vadd.f32 %v214_v56, %v206_v55 }
 0x3ae   :  { %841 = vtanh.f32 %v216_v57  ;;  %v279_v24 = vrot.slane %v216_v57, 6 }
 0x3b4   :  { %v842_v58 = vpop.eup %841 }
 0x3b5   :  { %219 = vrot.lane.b32.xlu1 %v842_v58, %s945_s2  ;;  %v1106_v58 = vadd.f32 %v1053_v5, %v1082_v0 }
 0x427   :  { %v220_v60 = vpop.permute.xlu1 %219 }
 0x428   :  { %v1077_v61 = vmul.f32 %v220_v60, %v200_v52 }
 0x42a   :  { %v229_v62 = vrot.slane %v1077_v61, 2 }
 0x42c   :  { %230 = vrot.lane.b32.xlu2 %v229_v62, %s946_s5 }
 0x486   :  { %v231_v63 = vpop.permute.xlu2 %230 }
 0x487   :  { %803 = vmatmul.msk.f32.vlgmr.msrb.gmra.mxu0 %vm85_vm2, %v231_v63 }
 0x504   :  { %v251_v2 = vpop.f32.mrf.mxu0 }
 0x505   :  { %v255_v4 = vrot.slane %v251_v2, 4 }
 0x507   :  { %v257_v6 = vadd.f32 %v255_v4, %v1056_v7 }
 0x509   :  { %843 = vtanh.f32 %v257_v6  ;;  %v804_v9 = vmul.f32 -1.442695, %v257_v6 }
 0x50b   :  { %845 = vpow2.f32 %v804_v9 }
 0x50f   :  { %v844_v8 = vpop.eup %843 }
 0x510   :  { %283 = vrot.lane.b32.xlu0 %v844_v8, %s943_s30 }
 0x511   :  { %v846_v10 = vpop.eup %845 }
 0x512   :  { %v261_v11 = vadd.f32 1.0, %v846_v10 }
 0x514   :  { %847 = vrcp.f32 %v261_v11  ;;  %v273_v17 = vand.u32 2147483648, %v261_v11  ;;  %vm267_vm13 = vweird.f32 %v261_v11  ;;  %v271_v18 = vand.u32 2147483647, %v261_v11 }
 0x516   :  { %v274_v20 = vor.u32 1.1754944e-38, %v273_v17  ;;  %vm272_vm15 = vcmp.eq.f32.partialorder %v271_v18, 8.507059e+37 }
 0x51a   :  { %v848_v12 = vpop.eup %847 }
 0x51b   :  { %v263_v13 = vmul.f32 %v848_v12, %v261_v11  ;;  %vm268_vm12 = vweird.f32 %v848_v12 }
 0x51c   :  { %vm269_vm14 = vmor %vm267_vm13, %vm268_vm12 }
 0x51d   :  { %v264_v14 = vsub.f32 1.0, %v263_v13 }
 0x51f   :  { %v265_v15 = vmul.f32 %v848_v12, %v264_v14 }
 0x521   :  { %v266_v16 = vadd.f32 %v848_v12, %v265_v15 }
 0x523   :  { %v270_v19 = vsel %vm269_vm14, %v848_v12, %v266_v16 }
 0x524   :  { %v275_v22 = vsel %vm272_vm15, %v274_v20, %v270_v19 }
 0x525   :  { %v281_v25 = vmul.f32 %v279_v24, %v275_v22 }
 0x582   :  { %v284_v21 = vpop.permute.xlu0 %283 }
 0x583   :  { %v286_v23 = vmul.f32 %v284_v21, %v275_v22 }
 0x585   :  { %288 = vrot.lane.b32.xlu1 %v286_v23, %s944_s15 }
 0x5f7   :  { %v289_v26 = vpop.permute.xlu1 %288 }
 0x5f8   :  { %v291_v27 = vadd.f32 %v289_v26, %v281_v25 }
 0x5fa   :  { %849 = vtanh.f32 %v291_v27  ;;  %v354_v49 = vrot.slane %v291_v27, 6 }
 0x600   :  { %v850_v28 = vpop.eup %849 }
 0x601   :  { %294 = vrot.lane.b32.xlu2 %v850_v28, %s945_s2 }
 0x65b   :  { %v295_v29 = vpop.permute.xlu2 %294 }
 0x65c   :  { %v1088_v30 = vmul.f32 %v295_v29, %v275_v22 }
 0x65e   :  { %v304_v31 = vrot.slane %v1088_v30, 4 }
 0x660   :  { %305 = vrot.lane.b32.xlu0 %v304_v31, %s946_s5 }
 0x6d2   :  { %v306_v32 = vpop.permute.xlu0 %305 }
 0x6d3   :  { %805 = vmatmul.msk.f32.vlgmr.msrb.gmra.mxu1 %vm85_vm2, %v306_v32 }
 0x6d4   :  { %614 = vmatpush.msrb.mxu1 %v1021_v1 }
 0x6d6   :  { %615 = vmatpush.msrb.mxu1 %v1030_v3 }
 0x750   :  { %v326_v33 = vpop.f32.mrf.mxu1 }
 0x751   :  { %v330_v34 = vrot.slane %v326_v33, 2 }
 0x753   :  { %v332_v35 = vadd.f32 %v330_v34, %v1056_v7 }
 0x755   :  { %851 = vtanh.f32 %v332_v35  ;;  %v806_v37 = vmul.f32 -1.442695, %v332_v35 }
 0x757   :  { %853 = vpow2.f32 %v806_v37 }
 0x75b   :  { %v852_v36 = vpop.eup %851 }
 0x75c   :  { %358 = vrot.lane.b32.xlu1 %v852_v36, %s943_s30 }
 0x75d   :  { %v854_v38 = vpop.eup %853 }
 0x75e   :  { %v336_v39 = vadd.f32 1.0, %v854_v38 }
 0x760   :  { %855 = vrcp.f32 %v336_v39  ;;  %v348_v3 = vand.u32 2147483648, %v336_v39  ;;  %vm342_vm1 = vweird.f32 %v336_v39  ;;  %v346_v44 = vand.u32 2147483647, %v336_v39 }
 0x762   :  { %v349_v45 = vor.u32 1.1754944e-38, %v348_v3  ;;  %vm347_vm4 = vcmp.eq.f32.partialorder %v346_v44, 8.507059e+37 }
 0x766   :  { %v856_v40 = vpop.eup %855 }
 0x767   :  { %v338_v41 = vmul.f32 %v856_v40, %v336_v39  ;;  %vm343_vm0 = vweird.f32 %v856_v40 }
 0x768   :  { %vm344_vm3 = vmor %vm342_vm1, %vm343_vm0 }
 0x769   :  { %v339_v42 = vsub.f32 1.0, %v338_v41 }
 0x76b   :  { %v340_v43 = vmul.f32 %v856_v40, %v339_v42 }
 0x76d   :  { %v341_v1 = vadd.f32 %v856_v40, %v340_v43 }
 0x76f   :  { %v345_v7 = vsel %vm344_vm3, %v856_v40, %v341_v1 }
 0x770   :  { %v350_v47 = vsel %vm347_vm4, %v349_v45, %v345_v7 }
 0x771   :  { %v356_v50 = vmul.f32 %v354_v49, %v350_v47 }
 0x7ce   :  { %v359_v46 = vpop.permute.xlu1 %358 }
 0x7cf   :  { %v361_v48 = vmul.f32 %v359_v46, %v350_v47 }
 0x7d1   :  { %363 = vrot.lane.b32.xlu2 %v361_v48, %s944_s15 }
 0x82b   :  { %v364_v51 = vpop.permute.xlu2 %363 }
 0x82c   :  { %v366_v52 = vadd.f32 %v364_v51, %v356_v50 }
 0x82e   :  { %857 = vtanh.f32 %v366_v52  ;;  %v426_v17 = vrot.slane %v366_v52, 6 }
 0x834   :  { %v858_v53 = vpop.eup %857 }
 0x835   :  { %369 = vrot.lane.b32.xlu0 %v858_v53, %s945_s2 }
 0x8a7   :  { %v370_v54 = vpop.permute.xlu0 %369 }
 0x8a8   :  { %v1099_v55 = vmul.f32 %v370_v54, %v350_v47 }
 0x8aa   :  { %v379_v56 = vrot.slane %v1099_v55, 6 }
 0x8ac   :  { %380 = vrot.lane.b32.xlu1 %v379_v56, %s946_s5 }
 0x91e   :  { %v381_v57 = vpop.permute.xlu1 %380 }
 0x91f   :  { %807 = vmatmul.msk.f32.vlgmr.msrb.gmra.mxu2 %vm85_vm2, %v381_v57 }
 0x9a2   :  { %v401_v59 = vpop.f32.mrf.mxu2 }
 0x9a3   :  { %v404_v60 = vadd.f32 %v401_v59, %v1106_v58 }
 0x9a5   :  { %859 = vtanh.f32 %v404_v60  ;;  %v808_v63 = vmul.f32 -1.442695, %v404_v60 }
 0x9a7   :  { %861 = vpow2.f32 %v808_v63 }
 0x9ab   :  { %v860_v62 = vpop.eup %859 }
 0x9ac   :  { %430 = vrot.lane.b32.xlu2 %v860_v62, %s943_s30 }
 0x9ad   :  { %v862_v2 = vpop.eup %861 }
 0x9ae   :  { %v408_v4 = vadd.f32 1.0, %v862_v2 }
 0x9b0   :  { %863 = vrcp.f32 %v408_v4  ;;  %v420_v5 = vand.u32 2147483648, %v408_v4  ;;  %vm414_vm6 = vweird.f32 %v408_v4  ;;  %v418_v0 = vand.u32 2147483647, %v408_v4 }
 0x9b2   :  { %v421_v13 = vor.u32 1.1754944e-38, %v420_v5  ;;  %vm419_vm9 = vcmp.eq.f32.partialorder %v418_v0, 8.507059e+37 }
 0x9b6   :  { %v864_v6 = vpop.eup %863 }
 0x9b7   :  { %v410_v8 = vmul.f32 %v864_v6, %v408_v4  ;;  %vm415_vm5 = vweird.f32 %v864_v6 }
 0x9b8   :  { %vm416_vm8 = vmor %vm414_vm6, %vm415_vm5  ;;  %vm227_vm6 = vcmask 125954  }
 0x9b9   :  { %v411_v9 = vsub.f32 1.0, %v410_v8 }
 0x9bb   :  { %v412_v10 = vmul.f32 %v864_v6, %v411_v9 }
 0x9bd   :  { %v413_v11 = vadd.f32 %v864_v6, %v412_v10 }
 0x9bf   :  { %v417_v12 = vsel %vm416_vm8, %v864_v6, %v413_v11  ;;  %vm302_vm8 = vcmask 128004  }
 0x9c0   :  { %v422_v15 = vsel %vm419_vm9, %v421_v13, %v417_v12  ;;  %vm377_vm9 = vcmask 130054  }
 0x9c1   :  { %v428_v18 = vmul.f32 %v426_v17, %v422_v15 }
 0xa06   :  { %v431_v14 = vpop.permute.xlu2 %430 }
 0xa07   :  { %v433_v16 = vmul.f32 %v431_v14, %v422_v15 }
 0xa09   :  { %435 = vrot.lane.b32.xlu0 %v433_v16, %s944_s15 }
 0xa7b   :  { %v436_v19 = vpop.permute.xlu0 %435 }
 0xa7c   :  { %v438_v20 = vadd.f32 %v436_v19, %v428_v18 }
 0xa7e   :  { %865 = vtanh.f32 %v438_v20  ;;  %v497_v3 = vrot.slane %v438_v20, 6 }
 0xa84   :  { %v866_v21 = vpop.eup %865 }
 0xa85   :  { %441 = vrot.lane.b32.xlu1 %v866_v21, %s945_s2 }
 0xaf7   :  { %v442_v22 = vpop.permute.xlu1 %441 }
 0xaf8   :  { %v444_v23 = vmul.f32 %v442_v22, %v422_v15 }
 0xafa   :  { %446 = vrot.lane.b32.xlu2 %v444_v23, %s946_s5 }
 0xb54   :  { %v447_v24 = vpop.permute.xlu2 %446 }
 0xb55   :  { %449 = vst.msk [vmem:[#allocation2 + $0x8] sm:$0x3] %vm155_vm7, %v447_v24  ;;  %809 = vmatmul.msk.f32.vlgmr.msra.gmra.mxu1 %vm85_vm2, %v447_v24 }
 0xbd2   :  { %v469_v25 = vpop.f32.mrf.mxu1 }
 0xbd3   :  { %v473_v26 = vrot.slane %v469_v25, 6 }
 0xbd5   :  { %v475_v27 = vadd.f32 %v473_v26, %v1106_v58 }
 0xbd7   :  { %867 = vtanh.f32 %v475_v27  ;;  %v810_v29 = vmul.f32 -1.442695, %v475_v27 }
 0xbd9   :  { %869 = vpow2.f32 %v810_v29 }
 0xbdd   :  { %v868_v28 = vpop.eup %867 }
 0xbde   :  { %501 = vrot.lane.b32.xlu0 %v868_v28, %s943_s30 }
 0xbdf   :  { %v870_v31 = vpop.eup %869 }
 0xbe0   :  { %v479_v32 = vadd.f32 1.0, %v870_v31 }
 0xbe2   :  { %871 = vrcp.f32 %v479_v32  ;;  %v491_v38 = vand.u32 2147483648, %v479_v32  ;;  %vm485_vm10 = vweird.f32 %v479_v32  ;;  %v489_v39 = vand.u32 2147483647, %v479_v32 }
 0xbe4   :  { %v492_v41 = vor.u32 1.1754944e-38, %v491_v38  ;;  %vm490_vm12 = vcmp.eq.f32.partialorder %v489_v39, 8.507059e+37 }
 0xbe8   :  { %v872_v33 = vpop.eup %871 }
 0xbe9   :  { %v481_v34 = vmul.f32 %v872_v33, %v479_v32  ;;  %vm486_vm7 = vweird.f32 %v872_v33 }
 0xbea   :  { %vm487_vm11 = vmor %vm485_vm10, %vm486_vm7 }
 0xbeb   :  { %v482_v35 = vsub.f32 1.0, %v481_v34 }
 0xbed   :  { %v483_v36 = vmul.f32 %v872_v33, %v482_v35 }
 0xbef   :  { %v484_v37 = vadd.f32 %v872_v33, %v483_v36 }
 0xbf1   :  { %v488_v40 = vsel %vm487_vm11, %v872_v33, %v484_v37 }
 0xbf2   :  { %v493_v43 = vsel %vm490_vm12, %v492_v41, %v488_v40 }
 0xbf3   :  { %v499_v44 = vmul.f32 %v497_v3, %v493_v43 }
 0xc50   :  { %v502_v42 = vpop.permute.xlu0 %501 }
 0xc51   :  { %v504_v1 = vmul.f32 %v502_v42, %v493_v43 }
 0xc53   :  { %506 = vrot.lane.b32.xlu1 %v504_v1, %s944_s15 }
 0xcc5   :  { %v507_v7 = vpop.permute.xlu1 %506 }
 0xcc6   :  { %v509_v45 = vadd.f32 %v507_v7, %v499_v44 }
 0xcc8   :  { %873 = vtanh.f32 %v509_v45  ;;  %v571_v12 = vrot.slane %v509_v45, 6  ;;  %v678_v45 = vld [vmem:[%s1224_s6 + $0x8] sm:$0xff] }
 0xcc9   :  { %703 = vmatpush.msra.mxu2 %v678_v45 }
 0xcce   :  { %v874_v46 = vpop.eup %873 }
 0xccf   :  { %512 = vrot.lane.b32.xlu2 %v874_v46, %s945_s2  ;;  %v677_v46 = vld [vmem:[%s1224_s6] sm:$0xff] }
 0xcd0   :  { %704 = vmatpush.msra.mxu2 %v677_v46 }
 0xd29   :  { %v513_v47 = vpop.permute.xlu2 %512 }
 0xd2a   :  { %v515_v48 = vmul.f32 %v513_v47, %v493_v43 }
 0xd2c   :  { %v521_v49 = vrot.slane %v515_v48, 2 }
 0xd2e   :  { %522 = vrot.lane.b32.xlu0 %v521_v49, %s946_s5 }
 0xda0   :  { %v523_v50 = vpop.permute.xlu0 %522 }
 0xda1   :  { %811 = vmatmul.msk.f32.vlgmr.msra.gmra.mxu0 %vm85_vm2, %v523_v50  ;;  %v729_v50 = vld [vmem:[%s1226_s8 + $0x78] sm:$0xff] }
 0xda2   :  { %734 = vmatpush.msra.mxu3 %v729_v50 }
 0xe1e   :  { %v543_v51 = vpop.f32.mrf.mxu0 }
 0xe1f   :  { %v547_v52 = vrot.slane %v543_v51, 4  ;;  %v728_v51 = vld [vmem:[%s1226_s8 + $0x70] sm:$0xff] }
 0xe20   :  { %735 = vmatpush.msra.mxu3 %v728_v51 }
 0xe21   :  { %v549_v53 = vadd.f32 %v547_v52, %v1106_v58  ;;  %v727_v52 = vld [vmem:[%s1226_s8 + $0x68] sm:$0xff] }
 0xe22   :  { %736 = vmatpush.msra.mxu3 %v727_v52 }
 0xe23   :  { %875 = vtanh.f32 %v549_v53  ;;  %v812_v56 = vmul.f32 -1.442695, %v549_v53  ;;  %v726_v53 = vld [vmem:[%s1226_s8 + $0x60] sm:$0xff] }
 0xe24   :  { %737 = vmatpush.msra.mxu3 %v726_v53 }
 0xe25   :  { %877 = vpow2.f32 %v812_v56  ;;  %v724_v56 = vld [vmem:[%s1226_s8 + $0x50] sm:$0xff] }
 0xe29   :  { %v876_v54 = vpop.eup %875 }
 0xe2a   :  { %575 = vrot.lane.b32.xlu1 %v876_v54, %s943_s30  ;;  %v725_v54 = vld [vmem:[%s1226_s8 + $0x58] sm:$0xff] }
 0xe2b   :  { %v878_v57 = vpop.eup %877  ;;  %738 = vmatpush.msra.mxu3 %v725_v54 }
 0xe2c   :  { %v553_v59 = vadd.f32 1.0, %v878_v57  ;;  %v723_v57 = vld [vmem:[%s1226_s8 + $0x48] sm:$0xff] }
 0xe2d   :  { %739 = vmatpush.msra.mxu3 %v724_v56 }
 0xe2e   :  { %879 = vrcp.f32 %v553_v59  ;;  %v565_v6 = vand.u32 2147483648, %v553_v59  ;;  %vm559_vm14 = vweird.f32 %v553_v59  ;;  %v563_v8 = vand.u32 2147483647, %v553_v59 }
 0xe2f   :  { %740 = vmatpush.msra.mxu3 %v723_v57 }
 0xe30   :  { %v566_v10 = vor.u32 1.1754944e-38, %v565_v6  ;;  %vm564_vm0 = vcmp.eq.f32.partialorder %v563_v8, 8.507059e+37  ;;  %v716_v6 = vld [vmem:[%s1226_s8 + $0x10] sm:$0xff] }
 0xe34   :  { %v880_v60 = vpop.eup %879 }
 0xe35   :  { %v555_v62 = vmul.f32 %v880_v60, %v553_v59  ;;  %vm560_vm13 = vweird.f32 %v880_v60  ;;  %v722_v59 = vld [vmem:[%s1226_s8 + $0x40] sm:$0xff] }
 0xe36   :  { %vm561_vm15 = vmor %vm559_vm14, %vm560_vm13  ;;  %741 = vmatpush.msra.mxu3 %v722_v59 }
 0xe37   :  { %v556_v63 = vsub.f32 1.0, %v555_v62  ;;  %v720_v62 = vld [vmem:[%s1226_s8 + $0x30] sm:$0xff] }
 0xe39   :  { %v557_v2 = vmul.f32 %v880_v60, %v556_v63  ;;  %v719_v63 = vld [vmem:[%s1226_s8 + $0x28] sm:$0xff] }
 0xe3b   :  { %v558_v4 = vadd.f32 %v880_v60, %v557_v2  ;;  %v718_v2 = vld [vmem:[%s1226_s8 + $0x20] sm:$0xff] }
 0xe3d   :  { %v562_v9 = vsel %vm561_vm15, %v880_v60, %v558_v4  ;;  %v721_v60 = vld [vmem:[%s1226_s8 + $0x38] sm:$0xff] }
 0xe3e   :  { %v567_v5 = vsel %vm564_vm0, %v566_v10, %v562_v9  ;;  %742 = vmatpush.msra.mxu3 %v721_v60  ;;  %v717_v4 = vld [vmem:[%s1226_s8 + $0x18] sm:$0xff]  ;;  %v715_v9 = vld [vmem:[%s1226_s8 + $0x8] sm:$0xff]  ;;  %v714_v10 = vld [vmem:[%s1226_s8] sm:$0xff] }
 0xe3f   :  { %v573_v13 = vmul.f32 %v571_v12, %v567_v5 }
 0xe40   :  { %743 = vmatpush.msra.mxu3 %v720_v62 }
 0xe42   :  { %744 = vmatpush.msra.mxu3 %v719_v63 }
 0xe44   :  { %745 = vmatpush.msra.mxu3 %v718_v2 }
 0xe46   :  { %746 = vmatpush.msra.mxu3 %v717_v4 }
 0xe48   :  { %747 = vmatpush.msra.mxu3 %v716_v6 }
 0xe4a   :  { %748 = vmatpush.msra.mxu3 %v715_v9 }
 0xe4c   :  { %749 = vmatpush.msra.mxu3 %v714_v10 }
 0xe9c   :  { %v576_v11 = vpop.permute.xlu1 %575 }
 0xe9d   :  { %v578_v0 = vmul.f32 %v576_v11, %v567_v5 }
 0xe9f   :  { %580 = vrot.lane.b32.xlu2 %v578_v0, %s944_s15 }
 0xef9   :  { %v581_v14 = vpop.permute.xlu2 %580 }
 0xefa   :  { %v583_v15 = vadd.f32 %v581_v14, %v573_v13 }
 0xefc   :  { %881 = vtanh.f32 %v583_v15  ;;  %v645_v41 = vrot.slane %v583_v15, 6 }
 0xf02   :  { %v882_v16 = vpop.eup %881 }
 0xf03   :  { %586 = vrot.lane.b32.xlu0 %v882_v16, %s945_s2 }
 0xf75   :  { %v587_v17 = vpop.permute.xlu0 %586 }
 0xf76   :  { %v589_v18 = vmul.f32 %v587_v17, %v567_v5  ;;  %v825_v5 = vld [vmem:[%s1225_s7] ss:$0 sm:$0xff] }
 0xf77   :  { %v826_v17 = vld [vmem:[%s1227_s9] ss:$0 sm:$0xff] }
 0xf78   :  { %v595_v19 = vrot.slane %v589_v18, 4 }
 0xf7a   :  { %596 = vrot.lane.b32.xlu1 %v595_v19, %s946_s5 }
 0xfec   :  { %v597_v20 = vpop.permute.xlu1 %596 }
 0xfed   :  { %813 = vmatmul.msk.f32.vlgmr.msrb.gmra.mxu1 %vm85_vm2, %v597_v20 }
0x106a   :  { %v617_v21 = vpop.f32.mrf.mxu1 }
0x106b   :  { %v621_v22 = vrot.slane %v617_v21, 2 }
0x106d   :  { %v623_v23 = vadd.f32 %v621_v22, %v1106_v58 }
0x106f   :  { %883 = vtanh.f32 %v623_v23  ;;  %v814_v25 = vmul.f32 -1.442695, %v623_v23 }
0x1071   :  { %885 = vpow2.f32 %v814_v25 }
0x1075   :  { %v884_v24 = vpop.eup %883 }
0x1076   :  { %649 = vrot.lane.b32.xlu2 %v884_v24, %s943_s30  ;;  %s769_s30 = sshll.u32 %s1229_s11, 4  ;;  %s770_s30 = int_to_ptr.hbm [resolvable:$true] %s769_s30 }
0x1077   :  { %v886_v26 = vpop.eup %885 }
0x1078   :  { %v627_v27 = vadd.f32 1.0, %v886_v26 }
0x107a   :  { %887 = vrcp.f32 %v627_v27  ;;  %v639_v58 = vand.u32 2147483648, %v627_v27  ;;  %vm633_vm3 = vweird.f32 %v627_v27  ;;  %v637_v34 = vand.u32 2147483647, %v627_v27 }
0x107c   :  { %v640_v36 = vor.u32 1.1754944e-38, %v639_v58  ;;  %vm638_vm5 = vcmp.eq.f32.partialorder %v637_v34, 8.507059e+37 }
0x107e   :  { %224 = vrot.lane.b32.xlu2 %v1077_v61, %s946_s5 }
0x1080   :  { %v888_v28 = vpop.eup %887 }
0x1081   :  { %v629_v29 = vmul.f32 %v888_v28, %v627_v27  ;;  %vm634_vm1 = vweird.f32 %v888_v28 }
0x1082   :  { %vm635_vm4 = vmor %vm633_vm3, %vm634_vm1 }
0x1083   :  { %v630_v31 = vsub.f32 1.0, %v629_v29 }
0x1085   :  { %v631_v32 = vmul.f32 %v888_v28, %v630_v31 }
0x1086   :  { %517 = vrot.lane.b32.xlu2 %v515_v48, %s946_s5 }
0x1087   :  { %v632_v33 = vadd.f32 %v888_v28, %v631_v32 }
0x1089   :  { %v636_v35 = vsel %vm635_vm4, %v888_v28, %v632_v33 }
0x108a   :  { %v641_v37 = vsel %vm638_vm5, %v640_v36, %v636_v35 }
0x108b   :  { %v647_v42 = vmul.f32 %v645_v41, %v641_v37 }
0x10d0   :  { %v650_v61 = vpop.permute.xlu2 %649 }
0x10d1   :  { %v652_v38 = vmul.f32 %v650_v61, %v641_v37 }
0x10d3   :  { %654 = vrot.lane.b32.xlu0 %v652_v38, %s944_s15 }
0x10d8   :  { %v225_v39 = vpop.permute.xlu2 %224 }
0x10d9   :  { %228 = vst.msk [vmem:[#allocation2] sm:$0xc] %vm227_vm6, %v225_v39 }
0x10db   :  { %299 = vrot.lane.b32.xlu0 %v1088_v30, %s946_s5 }
0x10e0   :  { %v518_v40 = vpop.permute.xlu2 %517 }
0x10e1   :  { %520 = vst.msk [vmem:[#allocation2 + $0x8] sm:$0xc] %vm227_vm6, %v518_v40 }
0x10e3   :  { %591 = vrot.lane.b32.xlu0 %v589_v18, %s946_s5 }
0x1145   :  { %v655_v43 = vpop.permute.xlu0 %654 }
0x1146   :  { %v657_v1 = vadd.f32 %v655_v43, %v647_v42 }
0x1148   :  { %889 = vtanh.f32 %v657_v1  ;;  %671 = vrot.lane.b32.xlu2 %v657_v1, %s947_s0 }
0x114d   :  { %v300_v3 = vpop.permute.xlu0 %299 }
0x114e   :  { %v890_v44 = vpop.eup %889  ;;  %303 = vst.msk [vmem:[#allocation2] sm:$0x30] %vm302_vm8, %v300_v3 }
0x114f   :  { %660 = vrot.lane.b32.xlu1 %v890_v44, %s945_s2  ;;  %s780_s2 = sshll.u32 %s1230_s12, 4  ;;  %s781_s2 = int_to_ptr.hbm [resolvable:$true] %s780_s2 }
0x1155   :  { %v592_v7 = vpop.permute.xlu0 %591 }
0x1156   :  { %594 = vst.msk [vmem:[#allocation2 + $0x8] sm:$0x30] %vm302_vm8, %v592_v7 }
0x1157   :  { %374 = vrot.lane.b32.xlu1 %v1099_v55, %s946_s5 }
0x11a2   :  { %v672_v30 = vpop.permute.xlu2 %671 }
0x11a3   :  { %674 = vst.msk [vmem:[#allocation5 - $0x6] sm:$0xc0] %vm377_vm9, %v672_v30 }
0x11a4   :  { %783 = dma.vmem_to_hbm [thread:$0]  %s779_s14, 32, %s781_s2, [#allocation6]  }
0x11c1   :  { %v661_v47 = vpop.permute.xlu1 %660 }
0x11c2   :  { %v663_v48 = vmul.f32 %v661_v47, %v641_v37 }
0x11c4   :  { %665 = vrot.lane.b32.xlu1 %v663_v48, %s946_s5 }
0x11c9   :  { %v375_v49 = vpop.permute.xlu1 %374 }
0x11ca   :  { %378 = vst.msk [vmem:[#allocation2] sm:$0xc0] %vm377_vm9, %v375_v49 }
0x11d1   :  { %v675_v55 = vld [vmem:[#allocation2] sm:$0xff] }
0x11d2   :  { %815 = vmatmul.msk.f32.vlgmr.msra.gmra.mxu2 %vm85_vm2, %v675_v55 }
0x1236   :  { %v666_v8 = vpop.permute.xlu1 %665 }
0x1237   :  { %668 = vst.msk [vmem:[#allocation2 + $0x8] sm:$0xc0] %vm377_vm9, %v666_v8 }
0x1238   :  { %669 = vst.msk [vmem:[#allocation3 - $0x6] sm:$0xc0] %vm377_vm9, %v666_v8 }
0x1239   :  { %772 = dma.vmem_to_hbm [thread:$0]  %s768_s1, 32, %s770_s30, [#allocation4]  }
0x123e   :  { %v676_v11 = vld [vmem:[#allocation2 + $0x8] sm:$0xff] }
0x123f   :  { %816 = vmatmul.msk.f32.gmra.mxu2 %vm85_vm2, %v676_v11  ;;  %vm757_vm2 = vcmask 15360  }
0x1255   :  { %v706_v0 = vpop.f32.mrf.mxu2 }
0x1256   :  { %v707_v12 = vadd.f32 %v825_v5, %v706_v0 }
0x1258   :  { %v712_v13 = vmax.f32 %v707_v12, 0.0 }
0x125a   :  { %750 = vmatmul.f32.vlgmr.msra.gmra.mxu3 %v712_v13 }
0x12c2   :  { %v709_v14 = vpop.f32.mrf.mxu2 }
0x12c3   :  { %v710_v15 = vadd.f32 %v825_v5, %v709_v14 }
0x12c5   :  { %v713_v16 = vmax.f32 %v710_v15, 0.0 }
0x12c7   :  { %753 = vmatmul.f32.gmra.mxu3 %v713_v16 }
0x12dd   :  { %v751_v18 = vpop.f32.mrf.mxu3 }
0x12de   :  { %v752_v19 = vadd.f32 %v826_v17, %v751_v18 }
0x12e0   :  { %758 = vst.msk [vmem:[%s1228_s10] sm:$0xff] %vm757_vm2, %v752_v19 }
0x134a   :  { %v754_v20 = vpop.f32.mrf.mxu3 }
0x134b   :  { %v755_v21 = vadd.f32 %v826_v17, %v754_v20 }
0x134d   :  { %759 = vst.msk [vmem:[%s1228_s10 + $0x8] sm:$0xff] %vm757_vm2, %v755_v21 }
0x134e   :  { %939 = dma.done.wait [#allocation4], 32  }
0x134f   :  { %940 = vsyncadd [#allocation4], 4294967264 }
0x1350   :  { %941 = dma.done.wait [#allocation6], 32  }
0x1351   :  { %942 = vsyncadd [#allocation6], 4294967264 }
0x1352   :  { %794 = vsyncpa [#allocation4], 1 }
0x1353   :  { %795 = vsyncpa [#allocation6], 1 }

</bundles_post_ra>
